<compile_context>
chip_gen: v5e
topology: v5e:2x2
jax: 0.10.0
libtpu: 0.0.40
codegen_flags: <defaults>
</compile_context>

<pallas_src>
import jax
import jax.numpy as jnp
from jax.experimental import pallas as pl
from jax.experimental.pallas import tpu as pltpu

EPS = 1e-5
VMEM_LIMIT_BYTES = 48 * 1024 * 1024    # safe on v5e/v6e (128 MiB) and v7x (64 MiB) VMEM
BLOCK_BUDGET_BYTES = 6 * 1024 * 1024   # per-step blocks+temps budget (Pallas double-buffers)
# bf16 here halves the y2 HBM round-trip (passes 2->3 are pure memory traffic) but is an
# accuracy trade-off; kept f32 to respect the 1e-4 verification tolerance.
INTERMEDIATE_DTYPE = jnp.float32


# ---------------------------------------------------------------------------
# In-kernel helpers
# ---------------------------------------------------------------------------
def _conv3_fused(h, w_ref):
    """Conv1d(kernel=3, padding=1, bias=False) as ONE MXU matmul.

    h:     (B, L, C_in) activations (length on sublanes, channels on lanes).
    w_ref: (3*C_in, C_out) Ref, taps stacked along the contraction axis
           (row k*C_in + ci  <->  torch weight [co, ci, k]).
    returns (B*L, C_out) float32.
    """
    B, L, C = h.shape
    z = jnp.zeros((B, 1, C), h.dtype)
    h_prev = jnp.concatenate([z, h[:, :L - 1, :]], axis=1)   # h[l-1], zero at l = 0
    h_next = jnp.concatenate([h[:, 1:, :], z], axis=1)       # h[l+1], zero at l = L-1
    taps = jnp.concatenate([h_prev, h, h_next], axis=-1)     # (B, L, 3*C)
    return jnp.dot(taps.reshape(B * L, 3 * C), w_ref[...],
                   preferred_element_type=jnp.float32)


def _channel_stats(acc):
    """Per-block two-pass stats: [sum, block-centered sum-of-squares] -> (2, C)."""
    s = jnp.sum(acc, axis=0, keepdims=True)
    m = s * (1.0 / acc.shape[0])
    d = acc - m
    css = jnp.sum(d * d, axis=0, keepdims=True)
    return jnp.concatenate([s, css], axis=0)


# ---------------------------------------------------------------------------
# Kernels (each grid step handles B_TILE batch rows)
# ---------------------------------------------------------------------------
def _pool_conv1_stats_kernel(x_ref, w1_ref, s_ref):
    # x_ref: (B, L2, 2*Cin) pre-folded NLC tile.  Emits BN1 partials only.
    x = x_ref[...]
    cin = x.shape[-1] // 2
    xp = jnp.maximum(x[..., :cin], x[..., cin:])       # MaxPool1d(2) as lane-slice max
    acc = _conv3_fused(xp, w1_ref)                     # (B*L2, Cmid) f32
    s_ref[...] = _channel_stats(acc)


def _conv1_bn_relu_conv2_kernel(x_ref, w1_ref, sc1_ref, sh1_ref, w2_ref, y2_ref, s_ref):
    # Recompute pool+conv1, fold BN1 into one per-channel scale/shift FMA, ReLU, conv2.
    x = x_ref[...]
    b, l2 = x.shape[0], x.shape[1]
    cin = x.shape[-1] // 2
    xp = jnp.maximum(x[..., :cin], x[..., cin:])
    a1 = _conv3_fused(xp, w1_ref)                                   # (B*L2, Cmid) f32
    h = jnp.maximum(a1 * sc1_ref[...] + sh1_ref[...], 0.0)
    a2 = _conv3_fused(h.reshape(b, l2, h.shape[-1]), w2_ref)        # (B*L2, Cout) f32
    s_ref[...] = _channel_stats(a2)
    cout = a2.shape[-1]
    # Emit y2 already in NCL layout so pass 3 and the final output are lane-dense in L2.
    y2_ref[...] = jnp.transpose(a2.reshape(b, l2, cout), (0, 2, 1)).astype(y2_ref.dtype)


def _bn2_relu_kernel(y2_ref, sc2_ref, sh2_ref, o_ref):
    # Pure element-wise pass; input/output layouts already match (B, Cout, L2).
    y = y2_ref[...].astype(jnp.float32)
    o_ref[...] = jnp.maximum(y * sc2_ref[...] + sh2_ref[...], 0.0).astype(o_ref.dtype)


# ---------------------------------------------------------------------------
# Host-side helpers
# ---------------------------------------------------------------------------
def _choose_batch_tile(n, per_row_bytes, budget_bytes):
    """Largest divisor of n under the VMEM budget, capped so the grid has >= 2 steps."""
    cap = max(1, n // 2)
    best = 1
    for d in range(1, n + 1):
        if n % d == 0 and d <= cap and d * per_row_bytes <= budget_bytes:
            best = d
    return best


def _fold_bn(stats, gamma, beta, rows_per_block, total_rows):
    """Chan-combine per-block (sum, centered sumsq) and fold BN into scale/shift."""
    s = stats[:, 0, :]                                   # (NB, C) per-block sums
    css = stats[:, 1, :]                                 # (NB, C) centered sum-of-squares
    mean_b = s / rows_per_block
    mean = jnp.sum(s, axis=0) / total_rows
    var = (jnp.sum(css, axis=0)
           + rows_per_block * jnp.sum((mean_b - mean) ** 2, axis=0)) / total_rows
    var = jnp.maximum(var, 0.0)                          # biased variance (training mode)
    scale = gamma * jax.lax.rsqrt(var + EPS)
    shift = beta - mean * scale
    return scale, shift


def down_forward(x_ncl, w1, w2, g1, b1, g2, b2):
    """x_ncl: (N, Cin, L) f32.  w1: (Cmid, Cin, 3), w2: (Cout, Cmid, 3) (torch layout)."""
    N, Cin, L = x_ncl.shape
    L2 = L // 2
    Cmid = w1.shape[0]
    Cout = w2.shape[0]

    # Torch (Cout, Cin, 3) -> (3*Cin, Cout): taps stacked along the contraction axis.
    w1s = jnp.transpose(w1, (2, 1, 0)).reshape(3 * Cin, Cmid)
    w2s = jnp.transpose(w2, (2, 1, 0)).reshape(3 * Cmid, Cout)

    # One-time NCL -> NLC transpose of the (smallest) tensor; the following reshape of
    # contiguous NLC memory is free and turns MaxPool1d(2) into a lane-slice max.
    x_nlc = jnp.transpose(x_ncl, (0, 2, 1))[:, :2 * L2, :]
    x_p = x_nlc.reshape(N, L2, 2 * Cin)

    # Per-batch-row footprint (blocks + in-kernel f32 temps) of the heaviest pass (pass 2).
    per_row_bytes = 4 * L2 * (6 * Cin + 6 * Cmid + 3 * Cout)
    bt = _choose_batch_tile(N, per_row_bytes, BLOCK_BUDGET_BYTES)
    nb = N // bt
    rows_per_block = bt * L2
    total_rows = N * L2

    cparams = pltpu.CompilerParams(
        dimension_semantics=("parallel",),
        vmem_limit_bytes=VMEM_LIMIT_BYTES,
    )

    # --- pass 1: MaxPool + Conv1 -> BN1 partial statistics only (y1 never hits HBM) ----
    st1 = pl.pallas_call(
        _pool_conv1_stats_kernel,
        grid=(nb,),
        in_specs=[
            pl.BlockSpec((bt, L2, 2 * Cin), lambda i: (i, 0, 0)),
            pl.BlockSpec((3 * Cin, Cmid), lambda i: (0, 0)),
        ],
        out_specs=pl.BlockSpec((None, 2, Cmid), lambda i: (i, 0, 0)),
        out_shape=jax.ShapeDtypeStruct((nb, 2, Cmid), jnp.float32),
        compiler_params=cparams,
    )(x_p, w1s)

    scale1, shift1 = _fold_bn(st1, g1, b1, rows_per_block, total_rows)

    # --- pass 2: recompute pool+Conv1, BN1+ReLU, Conv2 -> y2 (NCL) + BN2 partials ------
    y2, st2 = pl.pallas_call(
        _conv1_bn_relu_conv2_kernel,
        grid=(nb,),
        in_specs=[
            pl.BlockSpec((bt, L2, 2 * Cin), lambda i: (i, 0, 0)),
            pl.BlockSpec((3 * Cin, Cmid), lambda i: (0, 0)),
            pl.BlockSpec((1, Cmid), lambda i: (0, 0)),
            pl.BlockSpec((1, Cmid), lambda i: (0, 0)),
            pl.BlockSpec((3 * Cmid, Cout), lambda i: (0, 0)),
        ],
        out_specs=[
            pl.BlockSpec((bt, Cout, L2), lambda i: (i, 0, 0)),
            pl.BlockSpec((None, 2, Cout), lambda i: (i, 0, 0)),
        ],
        out_shape=[
            jax.ShapeDtypeStruct((N, Cout, L2), INTERMEDIATE_DTYPE),
            jax.ShapeDtypeStruct((nb, 2, Cout), jnp.float32),
        ],
        compiler_params=cparams,
    )(x_p, w1s, scale1.reshape(1, Cmid), shift1.reshape(1, Cmid), w2s)

    scale2, shift2 = _fold_bn(st2, g2, b2, rows_per_block, total_rows)

    # --- pass 3: BN2 + ReLU (layouts already NCL; pure element-wise) --------------------
    out = pl.pallas_call(
        _bn2_relu_kernel,
        grid=(nb,),
        in_specs=[
            pl.BlockSpec((bt, Cout, L2), lambda i: (i, 0, 0)),
            pl.BlockSpec((Cout, 1), lambda i: (0, 0)),
            pl.BlockSpec((Cout, 1), lambda i: (0, 0)),
        ],
        out_specs=pl.BlockSpec((bt, Cout, L2), lambda i: (i, 0, 0)),
        out_shape=jax.ShapeDtypeStruct((N, Cout, L2), jnp.float32),
        compiler_params=cparams,
    )(y2, scale2.reshape(Cout, 1), shift2.reshape(Cout, 1))

    return out


# ---------------------------------------------------------------------------
# Pure-JAX reference (mirrors the PyTorch train-mode forward)
# ---------------------------------------------------------------------------
def down_reference(x, w1, w2, g1, b1, g2, b2):
    N, Cin, L = x.shape
    L2 = L // 2
    xp = jnp.max(x[:, :, :2 * L2].reshape(N, Cin, L2, 2), axis=-1)  # MaxPool1d(2)

    def conv(h, w):
        return jax.lax.conv_general_dilated(
            h, w, window_strides=(1,), padding=((1, 1),),
            dimension_numbers=("NCH", "OIH", "NCH"))

    def bn_relu(y, g, b):
        mean = jnp.mean(y, axis=(0, 2), keepdims=True)
        var = jnp.mean((y - mean) ** 2, axis=(0, 2), keepdims=True)
        yn = (y - mean) / jnp.sqrt(var + EPS)
        yn = yn * g[None, :, None] + b[None, :, None]
        return jnp.maximum(yn, 0.0)

    y = bn_relu(conv(xp, w1), g1, b1)
    y = bn_relu(conv(y, w2), g2, b2)
    return y


if __name__ == "__main__":
    # Small shapes consistent with Down(in_channels=4, out_channels=8) on a 1-D signal.
    N, Cin, Cout, L = 2, 4, 8, 16
    Cmid = Cout

    key = jax.random.PRNGKey(0)
    kx, kw1, kw2 = jax.random.split(key, 3)

    x = jax.random.normal(kx, (N, Cin, L), dtype=jnp.float32)
    # Deterministic parameter init (synthetic stand-in for kaiming-uniform conv weights).
    w1 = 0.2 * jax.random.normal(kw1, (Cmid, Cin, 3), dtype=jnp.float32)
    w2 = 0.2 * jax.random.normal(kw2, (Cout, Cmid, 3), dtype=jnp.float32)
    # BatchNorm1d default affine init: gamma=1, beta=0.
    g1 = jnp.ones((Cmid,), jnp.float32)
    b1 = jnp.zeros((Cmid,), jnp.float32)
    g2 = jnp.ones((Cout,), jnp.float32)
    b2 = jnp.zeros((Cout,), jnp.float32)

    down_fn = jax.jit(down_forward)
    out = down_fn(x, w1, w2, g1, b1, g2, b2)
    out = jax.block_until_ready(out)

    ref = down_reference(x, w1, w2, g1, b1, g2, b2)
    assert out.shape == (N, Cout, L // 2), out.shape
    assert jnp.allclose(out, ref, atol=1e-4, rtol=1e-4), (
        float(jnp.max(jnp.abs(out - ref))))

    print("KERNEL_OK")
</pallas_src>

<mosaic_0001>
module attributes {stable_mosaic.version = 11 : i64} {
  func.func @_pool_conv1_stats_kernel(%arg0: i32, %arg1: memref<1x8x8xf32, #tpu.memory_space<vmem>>, %arg2: memref<12x8xf32, #tpu.memory_space<vmem>>, %arg3: memref<1x2x8xf32, #tpu.memory_space<vmem>>) attributes {dimension_semantics = [#tpu.dimension_semantics<parallel>], iteration_bounds = array<i64: 2>, scalar_prefetch = 0 : i64, scratch_operands = 0 : i64, tpu.core_type = #tpu.core_type<tc>, window_params = [{transform_indices = @transform_0, window_bounds = array<i64: 1, 8, 8>}, {pipeline_mode = #tpu.pipeline_mode<synchronous>, transform_indices = @transform_1, window_bounds = array<i64: 12, 8>}, {transform_indices = @transform_2, window_bounds = array<i64: 1, 2, 8>}]} {
    %c0 = arith.constant 0 : index
    %c0_0 = arith.constant 0 : index
    %c0_1 = arith.constant 0 : index
    %0 = vector.load %arg1[%c0, %c0_0, %c0_1] : memref<1x8x8xf32, #tpu.memory_space<vmem>>, vector<1x8x8xf32>
    %1 = vector.extract_strided_slice %0 {offsets = [0, 0, 0], sizes = [1, 8, 4], strides = [1, 1, 1]} : vector<1x8x8xf32> to vector<1x8x4xf32>
    %2 = vector.extract_strided_slice %0 {offsets = [0, 0, 4], sizes = [1, 8, 4], strides = [1, 1, 1]} : vector<1x8x8xf32> to vector<1x8x4xf32>
    %3 = arith.maximumf %1, %2 : vector<1x8x4xf32>
    %cst = arith.constant 0.000000e+00 : f32
    %4 = vector.broadcast %cst : f32 to vector<1x1x4xf32>
    %5 = vector.extract_strided_slice %3 {offsets = [0, 0, 0], sizes = [1, 7, 4], strides = [1, 1, 1]} : vector<1x8x4xf32> to vector<1x7x4xf32>
    %6 = tpu.concatenate %4, %5 in 1 : vector<1x1x4xf32>, vector<1x7x4xf32> -> vector<1x8x4xf32>
    %7 = vector.extract_strided_slice %3 {offsets = [0, 1, 0], sizes = [1, 7, 4], strides = [1, 1, 1]} : vector<1x8x4xf32> to vector<1x7x4xf32>
    %8 = tpu.concatenate %7, %4 in 1 : vector<1x7x4xf32>, vector<1x1x4xf32> -> vector<1x8x4xf32>
    %9 = tpu.concatenate %6, %3, %8 in 2 : vector<1x8x4xf32>, vector<1x8x4xf32>, vector<1x8x4xf32> -> vector<1x8x12xf32>
    %10 = vector.shape_cast %9 : vector<1x8x12xf32> to vector<8x12xf32>
    %c0_2 = arith.constant 0 : index
    %c0_3 = arith.constant 0 : index
    %11 = vector.load %arg2[%c0_2, %c0_3] : memref<12x8xf32, #tpu.memory_space<vmem>>, vector<12x8xf32>
    %cst_4 = arith.constant dense<0.000000e+00> : vector<8x8xf32>
    %12 = tpu.matmul %10, %11, %cst_4 {dimension_numbers = #tpu.dot_dimension_numbers<[1], [0], [0], [1], [0, 0, 1, 1], [], []>} : vector<8x12xf32>, vector<12x8xf32>, vector<8x8xf32> -> vector<8x8xf32>
    %cst_5 = arith.constant dense<0.000000e+00> : vector<8xf32>
    %13 = vector.multi_reduction <add>, %12, %cst_5 [0] : vector<8x8xf32> to vector<8xf32>
    %14 = vector.shape_cast %13 : vector<8xf32> to vector<1x8xf32>
    %cst_6 = arith.constant 1.250000e-01 : f32
    %15 = vector.broadcast %cst_6 : f32 to vector<1x8xf32>
    %16 = arith.mulf %14, %15 : vector<1x8xf32>
    %17 = vector.broadcast %16 : vector<1x8xf32> to vector<8x8xf32>
    %18 = arith.subf %12, %17 : vector<8x8xf32>
    %19 = arith.mulf %18, %18 : vector<8x8xf32>
    %cst_7 = arith.constant dense<0.000000e+00> : vector<8xf32>
    %20 = vector.multi_reduction <add>, %19, %cst_7 [0] : vector<8x8xf32> to vector<8xf32>
    %21 = vector.shape_cast %20 : vector<8xf32> to vector<1x8xf32>
    %22 = tpu.concatenate %14, %21 in 0 : vector<1x8xf32>, vector<1x8xf32> -> vector<2x8xf32>
    %c0_8 = arith.constant 0 : index
    %c0_9 = arith.constant 0 : index
    %c0_10 = arith.constant 0 : index
    %23 = vector.load %arg3[%c0_8, %c0_9, %c0_10] : memref<1x2x8xf32, #tpu.memory_space<vmem>>, vector<1x2x8xf32>
    %24 = vector.shape_cast %23 : vector<1x2x8xf32> to vector<2x8xf32>
    %25 = vector.shape_cast %22 : vector<2x8xf32> to vector<1x2x8xf32>
    tpu.vector_store %arg3[%c0_8, %c0_9, %c0_10], %25 {strides = array<i32>} : memref<1x2x8xf32, #tpu.memory_space<vmem>>, vector<1x2x8xf32>,
    return
  }
  func.func @transform_0(%arg0: i32) -> (i32, i32, i32) {
    %c0_i32 = arith.constant 0 : i32
    %c0_i32_0 = arith.constant 0 : i32
    %c0_i32_1 = arith.constant 0 : i32
    return %arg0, %c0_i32, %c0_i32_0 : i32, i32, i32
  }
  func.func @transform_1(%arg0: i32) -> (i32, i32) {
    %c0_i32 = arith.constant 0 : i32
    %c0_i32_0 = arith.constant 0 : i32
    %c0_i32_1 = arith.constant 0 : i32
    return %c0_i32, %c0_i32_0 : i32, i32
  }
  func.func @transform_2(%arg0: i32) -> (i32, i32, i32) {
    %c0_i32 = arith.constant 0 : i32
    %c0_i32_0 = arith.constant 0 : i32
    %c0_i32_1 = arith.constant 0 : i32
    return %arg0, %c0_i32, %c0_i32_0 : i32, i32, i32
  }
}

module attributes {stable_mosaic.version = 11 : i64} {
  func.func @_bn2_relu_kernel(%arg0: i32, %arg1: memref<1x8x8xf32, #tpu.memory_space<vmem>>, %arg2: memref<8x1xf32, #tpu.memory_space<vmem>>, %arg3: memref<8x1xf32, #tpu.memory_space<vmem>>, %arg4: memref<1x8x8xf32, #tpu.memory_space<vmem>>) attributes {dimension_semantics = [#tpu.dimension_semantics<parallel>], iteration_bounds = array<i64: 2>, scalar_prefetch = 0 : i64, scratch_operands = 0 : i64, tpu.core_type = #tpu.core_type<tc>, window_params = [{transform_indices = @transform_0, window_bounds = array<i64: 1, 8, 8>}, {pipeline_mode = #tpu.pipeline_mode<synchronous>, transform_indices = @transform_1, window_bounds = array<i64: 8, 1>}, {pipeline_mode = #tpu.pipeline_mode<synchronous>, transform_indices = @transform_2, window_bounds = array<i64: 8, 1>}, {transform_indices = @transform_3, window_bounds = array<i64: 1, 8, 8>}]} {
    %c0 = arith.constant 0 : index
    %c0_0 = arith.constant 0 : index
    %c0_1 = arith.constant 0 : index
    %0 = vector.load %arg1[%c0, %c0_0, %c0_1] : memref<1x8x8xf32, #tpu.memory_space<vmem>>, vector<1x8x8xf32>
    %c0_2 = arith.constant 0 : index
    %c0_3 = arith.constant 0 : index
    %1 = vector.load %arg2[%c0_2, %c0_3] : memref<8x1xf32, #tpu.memory_space<vmem>>, vector<8x1xf32>
    %2 = vector.shape_cast %1 : vector<8x1xf32> to vector<1x8x1xf32>
    %3 = vector.broadcast %2 : vector<1x8x1xf32> to vector<1x8x8xf32>
    %4 = arith.mulf %0, %3 : vector<1x8x8xf32>
    %c0_4 = arith.constant 0 : index
    %c0_5 = arith.constant 0 : index
    %5 = vector.load %arg3[%c0_4, %c0_5] : memref<8x1xf32, #tpu.memory_space<vmem>>, vector<8x1xf32>
    %6 = vector.shape_cast %5 : vector<8x1xf32> to vector<1x8x1xf32>
    %7 = vector.broadcast %6 : vector<1x8x1xf32> to vector<1x8x8xf32>
    %8 = arith.addf %4, %7 : vector<1x8x8xf32>
    %cst = arith.constant 0.000000e+00 : f32
    %9 = vector.broadcast %cst : f32 to vector<1x8x8xf32>
    %10 = arith.maximumf %8, %9 : vector<1x8x8xf32>
    %c0_6 = arith.constant 0 : index
    %c0_7 = arith.constant 0 : index
    %c0_8 = arith.constant 0 : index
    %11 = vector.load %arg4[%c0_6, %c0_7, %c0_8] : memref<1x8x8xf32, #tpu.memory_space<vmem>>, vector<1x8x8xf32>
    tpu.vector_store %arg4[%c0_6, %c0_7, %c0_8], %10 {strides = array<i32>} : memref<1x8x8xf32, #tpu.memory_space<vmem>>, vector<1x8x8xf32>,
    return
  }
  func.func @transform_0(%arg0: i32) -> (i32, i32, i32) {
    %c0_i32 = arith.constant 0 : i32
    %c0_i32_0 = arith.constant 0 : i32
    %c0_i32_1 = arith.constant 0 : i32
    return %arg0, %c0_i32, %c0_i32_0 : i32, i32, i32
  }
  func.func @transform_1(%arg0: i32) -> (i32, i32) {
    %c0_i32 = arith.constant 0 : i32
    %c0_i32_0 = arith.constant 0 : i32
    %c0_i32_1 = arith.constant 0 : i32
    return %c0_i32, %c0_i32_0 : i32, i32
  }
  func.func @transform_2(%arg0: i32) -> (i32, i32) {
    %c0_i32 = arith.constant 0 : i32
    %c0_i32_0 = arith.constant 0 : i32
    %c0_i32_1 = arith.constant 0 : i32
    return %c0_i32, %c0_i32_0 : i32, i32
  }
  func.func @transform_3(%arg0: i32) -> (i32, i32, i32) {
    %c0_i32 = arith.constant 0 : i32
    %c0_i32_0 = arith.constant 0 : i32
    %c0_i32_1 = arith.constant 0 : i32
    return %arg0, %c0_i32, %c0_i32_0 : i32, i32, i32
  }
}

module attributes {stable_mosaic.version = 11 : i64} {
  func.func @_conv1_bn_relu_conv2_kernel(%arg0: i32, %arg1: memref<1x8x8xf32, #tpu.memory_space<vmem>>, %arg2: memref<12x8xf32, #tpu.memory_space<vmem>>, %arg3: memref<1x8xf32, #tpu.memory_space<vmem>>, %arg4: memref<1x8xf32, #tpu.memory_space<vmem>>, %arg5: memref<24x8xf32, #tpu.memory_space<vmem>>, %arg6: memref<1x8x8xf32, #tpu.memory_space<vmem>>, %arg7: memref<1x2x8xf32, #tpu.memory_space<vmem>>) attributes {dimension_semantics = [#tpu.dimension_semantics<parallel>], iteration_bounds = array<i64: 2>, scalar_prefetch = 0 : i64, scratch_operands = 0 : i64, tpu.core_type = #tpu.core_type<tc>, window_params = [{transform_indices = @transform_0, window_bounds = array<i64: 1, 8, 8>}, {pipeline_mode = #tpu.pipeline_mode<synchronous>, transform_indices = @transform_1, window_bounds = array<i64: 12, 8>}, {pipeline_mode = #tpu.pipeline_mode<synchronous>, transform_indices = @transform_2, window_bounds = array<i64: 1, 8>}, {pipeline_mode = #tpu.pipeline_mode<synchronous>, transform_indices = @transform_3, window_bounds = array<i64: 1, 8>}, {pipeline_mode = #tpu.pipeline_mode<synchronous>, transform_indices = @transform_4, window_bounds = array<i64: 24, 8>}, {transform_indices = @transform_5, window_bounds = array<i64: 1, 8, 8>}, {transform_indices = @transform_6, window_bounds = array<i64: 1, 2, 8>}]} {
    %c0 = arith.constant 0 : index
    %c0_0 = arith.constant 0 : index
    %c0_1 = arith.constant 0 : index
    %0 = vector.load %arg1[%c0, %c0_0, %c0_1] : memref<1x8x8xf32, #tpu.memory_space<vmem>>, vector<1x8x8xf32>
    %1 = vector.extract_strided_slice %0 {offsets = [0, 0, 0], sizes = [1, 8, 4], strides = [1, 1, 1]} : vector<1x8x8xf32> to vector<1x8x4xf32>
    %2 = vector.extract_strided_slice %0 {offsets = [0, 0, 4], sizes = [1, 8, 4], strides = [1, 1, 1]} : vector<1x8x8xf32> to vector<1x8x4xf32>
    %3 = arith.maximumf %1, %2 : vector<1x8x4xf32>
    %cst = arith.constant 0.000000e+00 : f32
    %4 = vector.broadcast %cst : f32 to vector<1x1x4xf32>
    %5 = vector.extract_strided_slice %3 {offsets = [0, 0, 0], sizes = [1, 7, 4], strides = [1, 1, 1]} : vector<1x8x4xf32> to vector<1x7x4xf32>
    %6 = tpu.concatenate %4, %5 in 1 : vector<1x1x4xf32>, vector<1x7x4xf32> -> vector<1x8x4xf32>
    %7 = vector.extract_strided_slice %3 {offsets = [0, 1, 0], sizes = [1, 7, 4], strides = [1, 1, 1]} : vector<1x8x4xf32> to vector<1x7x4xf32>
    %8 = tpu.concatenate %7, %4 in 1 : vector<1x7x4xf32>, vector<1x1x4xf32> -> vector<1x8x4xf32>
    %9 = tpu.concatenate %6, %3, %8 in 2 : vector<1x8x4xf32>, vector<1x8x4xf32>, vector<1x8x4xf32> -> vector<1x8x12xf32>
    %10 = vector.shape_cast %9 : vector<1x8x12xf32> to vector<8x12xf32>
    %c0_2 = arith.constant 0 : index
    %c0_3 = arith.constant 0 : index
    %11 = vector.load %arg2[%c0_2, %c0_3] : memref<12x8xf32, #tpu.memory_space<vmem>>, vector<12x8xf32>
    %cst_4 = arith.constant dense<0.000000e+00> : vector<8x8xf32>
    %12 = tpu.matmul %10, %11, %cst_4 {dimension_numbers = #tpu.dot_dimension_numbers<[1], [0], [0], [1], [0, 0, 1, 1], [], []>} : vector<8x12xf32>, vector<12x8xf32>, vector<8x8xf32> -> vector<8x8xf32>
    %c0_5 = arith.constant 0 : index
    %c0_6 = arith.constant 0 : index
    %13 = vector.load %arg3[%c0_5, %c0_6] : memref<1x8xf32, #tpu.memory_space<vmem>>, vector<1x8xf32>
    %14 = vector.broadcast %13 : vector<1x8xf32> to vector<8x8xf32>
    %15 = arith.mulf %12, %14 : vector<8x8xf32>
    %c0_7 = arith.constant 0 : index
    %c0_8 = arith.constant 0 : index
    %16 = vector.load %arg4[%c0_7, %c0_8] : memref<1x8xf32, #tpu.memory_space<vmem>>, vector<1x8xf32>
    %17 = vector.broadcast %16 : vector<1x8xf32> to vector<8x8xf32>
    %18 = arith.addf %15, %17 : vector<8x8xf32>
    %cst_9 = arith.constant 0.000000e+00 : f32
    %19 = vector.broadcast %cst_9 : f32 to vector<8x8xf32>
    %20 = arith.maximumf %18, %19 : vector<8x8xf32>
    %21 = vector.shape_cast %20 : vector<8x8xf32> to vector<1x8x8xf32>
    %cst_10 = arith.constant 0.000000e+00 : f32
    %22 = vector.broadcast %cst_10 : f32 to vector<1x1x8xf32>
    %23 = vector.extract_strided_slice %21 {offsets = [0, 0, 0], sizes = [1, 7, 8], strides = [1, 1, 1]} : vector<1x8x8xf32> to vector<1x7x8xf32>
    %24 = tpu.concatenate %22, %23 in 1 : vector<1x1x8xf32>, vector<1x7x8xf32> -> vector<1x8x8xf32>
    %25 = vector.extract_strided_slice %21 {offsets = [0, 1, 0], sizes = [1, 7, 8], strides = [1, 1, 1]} : vector<1x8x8xf32> to vector<1x7x8xf32>
    %26 = tpu.concatenate %25, %22 in 1 : vector<1x7x8xf32>, vector<1x1x8xf32> -> vector<1x8x8xf32>
    %27 = tpu.concatenate %24, %21, %26 in 2 : vector<1x8x8xf32>, vector<1x8x8xf32>, vector<1x8x8xf32> -> vector<1x8x24xf32>
    %28 = vector.shape_cast %27 : vector<1x8x24xf32> to vector<8x24xf32>
    %c0_11 = arith.constant 0 : index
    %c0_12 = arith.constant 0 : index
    %29 = vector.load %arg5[%c0_11, %c0_12] : memref<24x8xf32, #tpu.memory_space<vmem>>, vector<24x8xf32>
    %cst_13 = arith.constant dense<0.000000e+00> : vector<8x8xf32>
    %30 = tpu.matmul %28, %29, %cst_13 {dimension_numbers = #tpu.dot_dimension_numbers<[1], [0], [0], [1], [0, 0, 1, 1], [], []>} : vector<8x24xf32>, vector<24x8xf32>, vector<8x8xf32> -> vector<8x8xf32>
    %cst_14 = arith.constant dense<0.000000e+00> : vector<8xf32>
    %31 = vector.multi_reduction <add>, %30, %cst_14 [0] : vector<8x8xf32> to vector<8xf32>
    %32 = vector.shape_cast %31 : vector<8xf32> to vector<1x8xf32>
    %cst_15 = arith.constant 1.250000e-01 : f32
    %33 = vector.broadcast %cst_15 : f32 to vector<1x8xf32>
    %34 = arith.mulf %32, %33 : vector<1x8xf32>
    %35 = vector.broadcast %34 : vector<1x8xf32> to vector<8x8xf32>
    %36 = arith.subf %30, %35 : vector<8x8xf32>
    %37 = arith.mulf %36, %36 : vector<8x8xf32>
    %cst_16 = arith.constant dense<0.000000e+00> : vector<8xf32>
    %38 = vector.multi_reduction <add>, %37, %cst_16 [0] : vector<8x8xf32> to vector<8xf32>
    %39 = vector.shape_cast %38 : vector<8xf32> to vector<1x8xf32>
    %40 = tpu.concatenate %32, %39 in 0 : vector<1x8xf32>, vector<1x8xf32> -> vector<2x8xf32>
    %c0_17 = arith.constant 0 : index
    %c0_18 = arith.constant 0 : index
    %c0_19 = arith.constant 0 : index
    %41 = vector.load %arg7[%c0_17, %c0_18, %c0_19] : memref<1x2x8xf32, #tpu.memory_space<vmem>>, vector<1x2x8xf32>
    %42 = vector.shape_cast %41 : vector<1x2x8xf32> to vector<2x8xf32>
    %43 = vector.shape_cast %40 : vector<2x8xf32> to vector<1x2x8xf32>
    tpu.vector_store %arg7[%c0_17, %c0_18, %c0_19], %43 {strides = array<i32>} : memref<1x2x8xf32, #tpu.memory_space<vmem>>, vector<1x2x8xf32>,
    %44 = vector.shape_cast %30 : vector<8x8xf32> to vector<1x8x8xf32>
    %45 = tpu.transpose %44, [0, 2, 1] : vector<1x8x8xf32> -> vector<1x8x8xf32>
    %c0_20 = arith.constant 0 : index
    %c0_21 = arith.constant 0 : index
    %c0_22 = arith.constant 0 : index
    %46 = vector.load %arg6[%c0_20, %c0_21, %c0_22] : memref<1x8x8xf32, #tpu.memory_space<vmem>>, vector<1x8x8xf32>
    tpu.vector_store %arg6[%c0_20, %c0_21, %c0_22], %45 {strides = array<i32>} : memref<1x8x8xf32, #tpu.memory_space<vmem>>, vector<1x8x8xf32>,
    return
  }
  func.func @transform_0(%arg0: i32) -> (i32, i32, i32) {
    %c0_i32 = arith.constant 0 : i32
    %c0_i32_0 = arith.constant 0 : i32
    %c0_i32_1 = arith.constant 0 : i32
    return %arg0, %c0_i32, %c0_i32_0 : i32, i32, i32
  }
  func.func @transform_1(%arg0: i32) -> (i32, i32) {
    %c0_i32 = arith.constant 0 : i32
    %c0_i32_0 = arith.constant 0 : i32
    %c0_i32_1 = arith.constant 0 : i32
    return %c0_i32, %c0_i32_0 : i32, i32
  }
  func.func @transform_2(%arg0: i32) -> (i32, i32) {
    %c0_i32 = arith.constant 0 : i32
    %c0_i32_0 = arith.constant 0 : i32
    %c0_i32_1 = arith.constant 0 : i32
    return %c0_i32, %c0_i32_0 : i32, i32
  }
  func.func @transform_3(%arg0: i32) -> (i32, i32) {
    %c0_i32 = arith.constant 0 : i32
    %c0_i32_0 = arith.constant 0 : i32
    %c0_i32_1 = arith.constant 0 : i32
    return %c0_i32, %c0_i32_0 : i32, i32
  }
  func.func @transform_4(%arg0: i32) -> (i32, i32) {
    %c0_i32 = arith.constant 0 : i32
    %c0_i32_0 = arith.constant 0 : i32
    %c0_i32_1 = arith.constant 0 : i32
    return %c0_i32, %c0_i32_0 : i32, i32
  }
  func.func @transform_5(%arg0: i32) -> (i32, i32, i32) {
    %c0_i32 = arith.constant 0 : i32
    %c0_i32_0 = arith.constant 0 : i32
    %c0_i32_1 = arith.constant 0 : i32
    return %arg0, %c0_i32, %c0_i32_0 : i32, i32, i32
  }
  func.func @transform_6(%arg0: i32) -> (i32, i32, i32) {
    %c0_i32 = arith.constant 0 : i32
    %c0_i32_0 = arith.constant 0 : i32
    %c0_i32_1 = arith.constant 0 : i32
    return %arg0, %c0_i32, %c0_i32_0 : i32, i32, i32
  }
}

</mosaic_0001>

<bundles_post_ra>
// kernel: down_forward.3
= control target key start
LH: loop header
LB: loop body
LE: loop exit
PB: predicated region body
PF: predicated region fallthrough
CT: control target
= control target key end

     0   :  { %s316_s9 = smov 0   ;;  %s348_s0 = inlined_call_operand.vmem [shape: f32[2,8,8], index: 0, kind: input, shape index: {}]   ;;  %s349_s1 = inlined_call_operand.vmem [shape: f32[12,8], index: 1, kind: input, shape index: {}]   ;;  %s350_s2 = inlined_call_operand.vmem [shape: f32[2,2,8], index: 2, kind: output, shape index: {}]  }
   0x1 LB: > { %s268_s10 = sadd.s32 4294967295, %s296_s9   ;;  %p272_p0 = scmp.ge.s32.totalorder %s296_s9, 1  ;;  %s296_s9 = sphi %s316_s9, %s12_s9  }
   0x2   : > { %p111_p1 = scmp.lt.s32.totalorder %s296_s9, 3 }
   0x4   : > { %p112_p2 = pnand %p272_p0, %p111_p1 }
   0x5   : > { %p131_p3 = scmp.lt.s32.totalorder (!%p112_p2), %s268_s10, 1  ;;  %s298_s15 = smov (!%p112_p2), 124  }
   0x6   : > { %115 = sbr.rel (%p112_p2) target bundleno = 411 (0x19b), region = 28  ;;  %s299_s16 = smov (!%p112_p2), 4  }
   0x7   : > { %s300_s17 = smov (!%p112_p2), 8  }
   0xb   : > { %s352_s10 = smov (!%p131_p3, %s268_s10), 1  ;;  %vm152_vm0 = vcmask 1046528   ;;  %v166_v5 = vld [vmem:[%s349_s1 + $0x8] sm:$0xf]  ;;  %vm171_vm1 = vcmask 1043456   ;;  %v165_v6 = vld [vmem:[%s349_s1] sm:$0xff] }
   0xc   : > { %s273_s11 = sshll.u32 %s352_s10, 3  ;;  %275 = vmatpush.msk.msra.mxu0 %vm171_vm1, %v166_v5  ;;  %vm148_vm2 = vcmask 1040384   ;;  %vm161_vm3 = vcmask 31744   ;;  %vm163_vm4 = vcmask 64512   ;;  %vm167_vm5 = vcmask 97280   ;;  %s274_s22 = sshll.u32 %s352_s10, 1 }
   0xd   : > { %s134_s14 = scalar_lea.vmem %s348_s0, %s273_s11  ;;  %s138_s25 = scalar_lea.vmem %s350_s2, %s274_s22  ;;  %vm213_vm6 = vcmask 58368  }
   0xe   : > { %v139_v0 = vld [vmem:[%s134_s14] sm:$0xff]  ;;  %190 = vmatpush.msra.mxu0 %v165_v6 }
   0xf   : > { %141 = vrot.lane.b32.xlu0 %v139_v0, %s298_s15 }
  0x81   : > { %v142_v1 = vpop.permute.xlu0 %141 }
  0x82   : > { %v144_v2 = vmax.f32 %v139_v0, %v142_v1 }
  0x84   : > { %154 = vrot.lane.b32.xlu0 %v144_v2, %s299_s16  ;;  %v150_v3 = vrot.slane %v144_v2, 1  ;;  %v146_v7 = vrot.slane %v144_v2, 7 }
  0x86   : > { %v153_v4 = vsel %vm152_vm0, %v150_v3, 0.0  ;;  %v149_v9 = vsel %vm148_vm2, 0.0, %v146_v7 }
  0x87   : > { %158 = vrot.lane.b32.xlu1 %v153_v4, %s300_s17 }
  0xf6   : > { %v155_v8 = vpop.permute.xlu0 %154 }
  0xf7   : > { %v162_v10 = vsel %vm161_vm3, %v149_v9, %v155_v8 }
  0xf9   : > { %v159_v11 = vpop.permute.xlu1 %158 }
  0xfa   : > { %v164_v12 = vsel %vm163_vm4, %v162_v10, %v159_v11 }
  0xfb   : > { %276 = vmatmul.msk.f32.vlgmr.msra.gmra.mxu0 %vm167_vm5, %v164_v12 }
 0x178   : > { %v192_v13 = vpop.f32.mrf.mxu0 }
 0x179   : > { %v195_v14 = vsel %vm163_vm4, %v192_v13, 0.0 }
 0x17a   : > { %v196_v15 = vrot.slane %v195_v14, 4 }
 0x17c   : > { %v197_v16 = vadd.f32 %v196_v15, %v195_v14 }
 0x17e   : > { %v198_v17 = vrot.slane %v197_v16, 2 }
 0x180   : > { %v199_v18 = vadd.f32 %v198_v17, %v197_v16 }
 0x182   : > { %v200_v19 = vrot.slane %v199_v18, 1 }
 0x184   : > { %v201_v20 = vadd.f32 %v200_v19, %v199_v18 }
 0x186   : > { %v202_v21 = vmul.f32 0.125, %v201_v20 }
 0x188   : > { %v203_v22 = vsub.f32 %v192_v13, %v202_v21 }
 0x18a   : > { %v204_v23 = vmul.f32 %v203_v22, %v203_v22 }
 0x18c   : > { %v205_v24 = vsel %vm163_vm4, %v204_v23, 0.0 }
 0x18d   : > { %v206_v25 = vrot.slane %v205_v24, 4 }
 0x18f   : > { %v207_v26 = vadd.f32 %v206_v25, %v205_v24 }
 0x191   : > { %v208_v27 = vrot.slane %v207_v26, 2 }
 0x193   : > { %v209_v28 = vadd.f32 %v208_v27, %v207_v26 }
 0x195   : > { %v210_v29 = vrot.slane %v209_v28, 1 }
 0x197   : > { %v211_v30 = vadd.f32 %v210_v29, %v209_v28 }
 0x199   : > { %v212_v31 = vsel %vm148_vm2, %v201_v20, %v211_v30 }
 0x19a   : > { %214 = vst.msk [vmem:[%s138_s25] sm:$0x3] %vm213_vm6, %v212_v31 }
 0x19b PF: > { %s12_s9 = sadd.s32 1, %s296_s9  }
 0x19c   : > { %p9_p4 = scmp.ge.s32.totalorder %s12_s9, 4  }
 0x19e   :  { %11 = sbr.rel (!%p9_p4) target bundleno = 1 (0x1), region = 58 }

// kernel: down_forward.5
= control target key start
LH: loop header
LB: loop body
LE: loop exit
PB: predicated region body
PF: predicated region fallthrough
CT: control target
= control target key end

     0   :  { %8 = vsyncpa [#allocation3], 0  ;;  %s486_s0 = inlined_call_operand.vmem [shape: f32[2,8,8], index: 0, kind: input, shape index: {}]   ;;  %s487_s1 = inlined_call_operand.vmem [shape: f32[8,1], index: 1, kind: input, shape index: {}]   ;;  %s488_s2 = inlined_call_operand.vmem [shape: f32[8,1], index: 2, kind: input, shape index: {}]   ;;  %s489_s3 = inlined_call_operand.hbm [shape: f32[2,8,8], index: 3, kind: output, shape index: {}]  }
   0x1   :  { %10 = vsyncpa [#allocation3 + $0x1], 0  ;;  %s395_s12 = smov 0   ;;  %s397_s13 = smov 0  }
   0x2   :  { %s399_s14 = smov 0   ;;  %s401_s15 = smov 0  }
   0x3 LB: > { %s416_s16 = sadd.s32 4294967295, %s372_s15   ;;  %s259_s17 = sadd.s32 4294967294, %s372_s15   ;;  %s372_s15 = sphi %s401_s15, %s495_s15   ;;  %s368_s14 = sphi %s399_s14, %s494_s14   ;;  %s364_s13 = sphi %s397_s13, %s493_s13   ;;  %s360_s12 = sphi %s395_s12, %s492_s12  }
   0x4   : > { %s420_s18 = sadd.s32 1, %s372_s15   ;;  %s91_s19 = sadd.s32 1, %s368_s14 }
   0x5   : > { %s88_s20 = ssub.s32 %s372_s15, %s420_s18  ;;  %p101_p0 = scmp.ne.s32.totalorder %s368_s14, %s364_s13 }
   0x6   : > { %p89_p1 = scmp.eq.s32.totalorder %s88_s20, 0  ;;  %p102_p2 = scmp.eq.s32.totalorder %s416_s16, 1 }
   0x7   : > { %p107_p3 = scmp.ne.s32.totalorder %s364_s13, %s360_s12  ;;  %p108_p4 = scmp.eq.s32.totalorder %s259_s17, 1 }
   0x8   : > { %s431_s21 = scalar_select %p89_p1, %s368_s14, %s91_s19  }
   0x9   : > { %p433_p5 = por %p102_p2, %p101_p0  ;;  %p437_p6 = por %p108_p4, %p107_p3 }
   0xa   : > { %p262_p7 = scmp.ge.s32.totalorder %s372_s15, 1  ;;  %p139_p8 = scmp.lt.s32.totalorder %s372_s15, 3 }
   0xc   : > { %p140_p9 = pnand %p262_p7, %p139_p8 }
   0xd   : > { %p162_p10 = scmp.lt.s32.totalorder (!%p140_p9), %s416_s16, 1  ;;  %s159_s30 = sand.u32 (!%p140_p9), 1, %s364_s13  }
   0xe   : > { %143 = sbr.rel (%p140_p9) target bundleno = 151 (0x97), region = 32  ;;  %s263_s7 = sshll.u32 (!%p140_p9), %s159_s30, 3 }
   0xf   : > { %s266_s8 = sshll.u32 (!%p140_p9), %s416_s16, 3  ;;  %s161_s17 = scalar_lea.vmem (!%p140_p9), [#allocation2], %s263_s7 }
  0x10   : > { %s195_s11 = scalar_lea.hbm (!%p140_p9), %s489_s3, %s266_s8  ;;  %s197_s19 = sshll.u32 (!%p140_p9), %s161_s17, 4  ;;  %s198_s19 = int_to_ptr.vmem [resolvable:$true] %s197_s19 }
  0x11   : > { %s199_s20 = sshll.u32 (!%p140_p9), %s195_s11, 4  ;;  %s185_s24 = scalar_lea.sflag (!%p140_p9), [#allocation3], %s159_s30  ;;  %s200_s20 = int_to_ptr.hbm [resolvable:$true] %s199_s20 }
  0x12   : > { %s324_s25 = sshra.s32 (!%p140_p9), %s200_s20, 4  ;;  %s325_s25 = int_to_ptr.hbm [resolvable:$true] %s324_s25 }
  0x13   : > { %v167_v0 = vld [vmem:[%s487_s1] sm:$0xff]  ;;  %v374_v1 = vmov 0   ;;  %s163_s28 = scalar_select %p162_p10, %s416_s16, 1  ;;  %vm182_vm0 = vcmask 64512  }
  0x14   : > { %309 = vset.pattern.permute.xlu0 %v374_v1  ;;  %v174_v2 = vld [vmem:[%s488_s2] sm:$0xff]  ;;  %s326_s16 = scalar_lea.hbm %s325_s25, 8  ;;  %p331_p0 = scmp.lt.s32.totalorder %s325_s25, %s489_s3 }
  0x15   : > { %170 = vperm.xlu0 %309, %v167_v0   ;;  %s264_s29 = sshll.u32 %s163_s28, 3  ;;  %p327_p11 = scmp.ne.s32.totalorder %s325_s25, %s326_s16 }
  0x16   : > { %s165_s6 = scalar_lea.vmem %s486_s0, %s264_s29  ;;  %s330_s28 = scalar_lea.hbm %s489_s3, 16 }
  0x17   : > { %v166_v4 = vld [vmem:[%s165_s6] sm:$0xff]  ;;  %p328_p12 = pnand %p327_p11, %p433_p5  ;;  %p332_p1 = scmp.lt.s32.totalorder %s330_s28, %s326_s16 }
  0x19   : > { %p329_p13 = pneg %p328_p12  ;;  %p333_p2 = por %p332_p1, %p331_p0 }
  0x1b   : > { %p334_p3 = pnand %p333_p2, %p329_p13 }
  0x1d   : > { %177 = vperm.xlu0 %309, %v174_v2  }
  0x87   : > { %v171_v3 = vpop.permute.xlu0 %170 }
  0x88   : > { %v173_v5 = vmul.f32 %v171_v3, %v166_v4 }
  0x8f   : > { %v178_v6 = vpop.permute.xlu0 %177 }
  0x90   : > { %v180_v7 = vadd.f32 %v178_v6, %v173_v5 }
  0x92   : > { %v181_v8 = vmax.f32 %v180_v7, 0.0 }
  0x94   : > { %183 = vst.msk [vmem:[%s161_s17] sm:$0xff] %vm182_vm0, %v181_v8 }
  0x95   : > { %337 = shalt.err (!%p334_p3)
}
  0x96   : > { %269 = dma.vmem_to_hbm [thread:$0]  (%p433_p5), %s198_s19, 128, %s200_s20, %s185_s24  }
  0x97 PF: > { %p275_p4 = scmp.ge.s32.totalorder %s372_s15, 2  ;;  %s211_s30 = sand.u32 1, %s360_s12  }
  0x98   : > { %s212_s5 = scalar_lea.sflag [#allocation3], %s211_s30 }
  0x99   : > { %p272_p7 = pnand %p275_p4, %p437_p6 }
  0x9b   : > { %p273_p8 = pneg %p272_p7 }
  0x9d   : > { %355 = dma.done.wait (%p273_p8), %s212_s5, 128  }
  0x9e   : > { %357 = vsyncadd (%p273_p8), %s212_s5, 4294967168  ;;  %p13_p9 = scmp.ge.s32.totalorder %s420_s18, 4   ;;  %s492_s12 = smov %s364_s13 }
  0x9f   : > { %s493_s13 = smov %s368_s14  ;;  %s494_s14 = smov %s431_s21 }
  0xa0   : > { %s495_s15 = smov %s420_s18  ;;  %15 = sbr.rel (!%p13_p9) target bundleno = 3 (0x3), region = 67 }
  0xa5   :  { %218 = vsyncpa [#allocation3], 1 }
  0xa6   :  { %220 = vsyncpa [#allocation3 + $0x1], 1 }

// kernel: down_forward.4
= control target key start
LH: loop header
LB: loop body
LE: loop exit
PB: predicated region body
PF: predicated region fallthrough
CT: control target
= control target key end

     0   :  { %s581_s21 = smov 0   ;;  %s640_s0 = inlined_call_operand.vmem [shape: f32[2,8,8], index: 0, kind: input, shape index: {}]   ;;  %s641_s1 = inlined_call_operand.vmem [shape: f32[12,8], index: 1, kind: input, shape index: {}]   ;;  %s642_s2 = inlined_call_operand.vmem [shape: f32[1,8], index: 2, kind: input, shape index: {}]   ;;  %s643_s3 = inlined_call_operand.vmem [shape: f32[1,8], index: 3, kind: input, shape index: {}]   ;;  %s644_s4 = inlined_call_operand.vmem [shape: f32[24,8], index: 4, kind: input, shape index: {}]   ;;  %s645_s5 = inlined_call_operand.vmem [shape: f32[2,8,8], index: 5, kind: output, shape index: {0}]   ;;  %s646_s6 = inlined_call_operand.vmem [shape: f32[2,2,8], index: 6, kind: output, shape index: {1}]  }
   0x1 LB: > { %s506_s22 = sadd.s32 4294967295, %s540_s21   ;;  %p510_p0 = scmp.ge.s32.totalorder %s540_s21, 1  ;;  %s540_s21 = sphi %s581_s21, %s17_s21  }
   0x2   : > { %p214_p1 = scmp.lt.s32.totalorder %s540_s21, 3 }
   0x4   : > { %p215_p2 = pnand %p510_p0, %p214_p1 }
   0x5   : > { %p246_p3 = scmp.lt.s32.totalorder (!%p215_p2), %s506_s22, 1  ;;  %s542_s27 = smov (!%p215_p2), 124  }
   0x6   : > { %218 = sbr.rel (%p215_p2) target bundleno = 781 (0x30d), region = 40  ;;  %s543_s28 = smov (!%p215_p2), 4  }
   0x7   : > { %s544_s29 = smov (!%p215_p2), 8   ;;  %s545_s14 = smov (!%p215_p2), 16  }
   0xb   : > { %s648_s22 = smov (!%p246_p3, %s506_s22), 1  ;;  %vm271_vm0 = vcmask 1046528   ;;  %v285_v5 = vld [vmem:[%s641_s1 + $0x8] sm:$0xf]  ;;  %vm290_vm1 = vcmask 1043456   ;;  %v284_v6 = vld [vmem:[%s641_s1] sm:$0xff] }
   0xc   : > { %s511_s23 = sshll.u32 %s648_s22, 3  ;;  %514 = vmatpush.msk.msra.mxu0 %vm290_vm1, %v285_v5  ;;  %vm267_vm2 = vcmask 1040384   ;;  %vm280_vm3 = vcmask 31744   ;;  %vm282_vm4 = vcmask 64512   ;;  %vm286_vm5 = vcmask 97280   ;;  %v344_v21 = vld [vmem:[%s644_s4 + $0x10] sm:$0xff] }
   0xd   : > { %s249_s26 = scalar_lea.vmem %s640_s0, %s511_s23  ;;  %v532_v13 = vld [vmem:[%s642_s2] ss:$0 sm:$0xff]  ;;  %v343_v22 = vld [vmem:[%s644_s4 + $0x8] sm:$0xff]  ;;  %362 = vmatpush.msra.mxu1 %v344_v21  ;;  %vm340_vm6 = vcmask 130048   ;;  %vm345_vm7 = vcmask 195584   ;;  %s513_s24 = sshll.u32 %s648_s22, 1 }
   0xe   : > { %v258_v0 = vld [vmem:[%s249_s26] sm:$0xff]  ;;  %309 = vmatpush.msra.mxu0 %v284_v6  ;;  %vm387_vm8 = vcmask 58368   ;;  %s253_s30 = scalar_lea.vmem %s645_s5, %s511_s23 }
   0xf   : > { %260 = vrot.lane.b32.xlu0 %v258_v0, %s542_s27  ;;  %v533_v14 = vld [vmem:[%s643_s3] ss:$0 sm:$0xff]  ;;  %363 = vmatpush.msra.mxu1 %v343_v22  ;;  %s257_s27 = scalar_lea.vmem %s646_s6, %s513_s24 }
  0x10   : > { %v342_v23 = vld [vmem:[%s644_s4] sm:$0xff] }
  0x11   : > { %364 = vmatpush.msra.mxu1 %v342_v23 }
  0x81   : > { %v261_v1 = vpop.permute.xlu0 %260 }
  0x82   : > { %v263_v2 = vmax.f32 %v258_v0, %v261_v1 }
  0x84   : > { %273 = vrot.lane.b32.xlu0 %v263_v2, %s543_s28  ;;  %v269_v3 = vrot.slane %v263_v2, 1  ;;  %v265_v7 = vrot.slane %v263_v2, 7 }
  0x86   : > { %v272_v4 = vsel %vm271_vm0, %v269_v3, 0.0  ;;  %v268_v9 = vsel %vm267_vm2, 0.0, %v265_v7 }
  0x87   : > { %277 = vrot.lane.b32.xlu1 %v272_v4, %s544_s29 }
  0xf6   : > { %v274_v8 = vpop.permute.xlu0 %273 }
  0xf7   : > { %v281_v10 = vsel %vm280_vm3, %v268_v9, %v274_v8 }
  0xf9   : > { %v278_v11 = vpop.permute.xlu1 %277 }
  0xfa   : > { %v283_v12 = vsel %vm282_vm4, %v281_v10, %v278_v11 }
  0xfb   : > { %515 = vmatmul.msk.f32.vlgmr.msra.gmra.mxu0 %vm286_vm5, %v283_v12 }
 0x178   : > { %v311_v15 = vpop.f32.mrf.mxu0 }
 0x179   : > { %v318_v16 = vmul.f32 %v532_v13, %v311_v15 }
 0x17b   : > { %v323_v17 = vadd.f32 %v533_v14, %v318_v16 }
 0x17d   : > { %v324_v18 = vmax.f32 %v323_v17, 0.0 }
 0x17f   : > { %332 = vrot.lane.b32.xlu1 %v324_v18, %s544_s29  ;;  %v329_v19 = vrot.slane %v324_v18, 1  ;;  %v326_v24 = vrot.slane %v324_v18, 7 }
 0x181   : > { %v331_v20 = vsel %vm271_vm0, %v329_v19, 0.0  ;;  %v328_v26 = vsel %vm267_vm2, 0.0, %v326_v24 }
 0x182   : > { %336 = vrot.lane.b32.xlu2 %v331_v20, %s545_s14 }
 0x1dc   : > { %v337_v27 = vpop.permute.xlu2 %336 }
 0x1f1   : > { %v333_v25 = vpop.permute.xlu1 %332 }
 0x1f2   : > { %v339_v28 = vsel %vm282_vm4, %v328_v26, %v333_v25 }
 0x1f3   : > { %v341_v29 = vsel %vm340_vm6, %v339_v28, %v337_v27 }
 0x1f4   : > { %516 = vmatmul.msk.f32.vlgmr.msra.gmra.mxu1 %vm345_vm7, %v341_v29 }
 0x271   : > { %v366_v30 = vpop.f32.mrf.mxu1 }
 0x272   : > { %v369_v31 = vsel %vm282_vm4, %v366_v30, 0.0  ;;  %389 = vxpose.xlu2.b32.start.end [1/1] (short) (narrow) %v366_v30, 8 }
 0x273   : > { %v370_v32 = vrot.slane %v369_v31, 4 }
 0x275   : > { %v371_v33 = vadd.f32 %v370_v32, %v369_v31 }
 0x277   : > { %v372_v34 = vrot.slane %v371_v33, 2 }
 0x279   : > { %v373_v35 = vadd.f32 %v372_v34, %v371_v33 }
 0x27b   : > { %v374_v36 = vrot.slane %v373_v35, 1 }
 0x27d   : > { %v375_v37 = vadd.f32 %v374_v36, %v373_v35 }
 0x27f   : > { %v376_v38 = vmul.f32 0.125, %v375_v37 }
 0x281   : > { %v377_v39 = vsub.f32 %v366_v30, %v376_v38 }
 0x283   : > { %v378_v40 = vmul.f32 %v377_v39, %v377_v39 }
 0x285   : > { %v379_v41 = vsel %vm282_vm4, %v378_v40, 0.0 }
 0x286   : > { %v380_v42 = vrot.slane %v379_v41, 4 }
 0x288   : > { %v381_v43 = vadd.f32 %v380_v42, %v379_v41 }
 0x28a   : > { %v382_v44 = vrot.slane %v381_v43, 2 }
 0x28c   : > { %v383_v45 = vadd.f32 %v382_v44, %v381_v43 }
 0x28e   : > { %v384_v46 = vrot.slane %v383_v45, 1 }
 0x290   : > { %v385_v47 = vadd.f32 %v384_v46, %v383_v45 }
 0x292   : > { %v386_v48 = vsel %vm267_vm2, %v375_v37, %v385_v47 }
 0x293   : > { %388 = vst.msk [vmem:[%s257_s27] sm:$0x3] %vm387_vm8, %v386_v48 }
 0x30b   : > { %v405_v49 = vpop.trf.xlu2 }
 0x30c   : > { %421 = vst.msk [vmem:[%s253_s30] sm:$0xff] %vm282_vm4, %v405_v49 }
 0x30d PF: > { %s17_s21 = sadd.s32 1, %s540_s21  }
 0x30e   : > { %p14_p4 = scmp.ge.s32.totalorder %s17_s21, 4  }
 0x310   :  { %16 = sbr.rel (!%p14_p4) target bundleno = 1 (0x1), region = 82 }

</bundles_post_ra>
